<compile_context>
chip_gen: v6e
topology: v6e:2x2x1
jax: 0.10.0
libtpu: 0.0.40
codegen_flags: <defaults>
</compile_context>

<pallas_src>
import functools

import jax
import jax.numpy as jnp
from jax.experimental import pallas as pl
from jax.experimental.pallas import tpu as pltpu


def _cdiv(a, b):
    return -(-a // b)


def _round_up(x, m):
    return (x + m - 1) // m * m


def _pad2d(a, rows, cols):
    r, c = a.shape
    if r == rows and c == cols:
        return a
    return jnp.pad(a, ((0, rows - r), (0, cols - c)))


def _tpu_vmem_capacity_bytes():
    try:
        info = pltpu.get_tpu_info()
        cap = int(getattr(info, "vmem_capacity_bytes", 0))
        if cap > 0:
            return cap
    except Exception:
        pass
    return 128 << 20  # v5e/v6e default


def _tpu_device_kind():
    try:
        return jax.devices()[0].device_kind.lower()
    except Exception:
        return ""


# --------------------------------------------------------------------------
# Kernels
# --------------------------------------------------------------------------
def _ffnn_resident_kernel(x_ref, w1_ref, b1_ref, w2_ref, b2_ref, o_ref):
    """Both weight matrices resident in VMEM; one batch tile per grid step."""
    # fc1: (TB, In) @ (In, H) -> f32 accumulation on the MXU.
    h = jnp.dot(x_ref[...], w1_ref[...], preferred_element_type=jnp.float32)
    # Bias + ReLU in b1's dtype (f32 on v5e, bf16 on v6e/v7x bf16 path).
    h = jnp.maximum(h.astype(b1_ref.dtype) + b1_ref[...], 0).astype(w2_ref.dtype)
    # fc2: (TB, H) @ (H, Out) -> f32 accumulation; bias add in f32.
    o = jnp.dot(h, w2_ref[...], preferred_element_type=jnp.float32)
    o_ref[...] = (o + b2_ref[...]).astype(o_ref.dtype)


def _ffnn_hidden_tiled_kernel(x_ref, w1_ref, b1_ref, w2_ref, b2_ref, o_ref, acc_ref):
    """Hidden dimension streamed in chunks; f32 accumulator in VMEM scratch."""
    k = pl.program_id(1)

    @pl.when(k == 0)
    def _():
        acc_ref[...] = jnp.zeros_like(acc_ref)

    h = jnp.dot(x_ref[...], w1_ref[...], preferred_element_type=jnp.float32)
    h = jnp.maximum(h.astype(b1_ref.dtype) + b1_ref[...], 0).astype(w2_ref.dtype)
    acc_ref[...] += jnp.dot(h, w2_ref[...], preferred_element_type=jnp.float32)

    @pl.when(k == pl.num_programs(1) - 1)
    def _():
        o_ref[...] = (acc_ref[...] + b2_ref[...]).astype(o_ref.dtype)


# --------------------------------------------------------------------------
# Wrapper
# --------------------------------------------------------------------------
@functools.partial(jax.jit, static_argnames=("block_b", "block_h", "matmul_dtype"))
def ffnn_forward(x, w1, b1, w2, b2, *, block_b=None, block_h=None, matmul_dtype=None):
    """y = relu(x @ w1 + b1) @ w2 + b2 with a lane-padded, batch-tiled Pallas call."""
    B, in_f = x.shape
    hid_f = w1.shape[1]
    out_f = w2.shape[1]
    out_dtype = x.dtype

    mdt = jnp.dtype(matmul_dtype) if matmul_dtype is not None else jnp.dtype(x.dtype)
    mb = mdt.itemsize
    ob = jnp.dtype(out_dtype).itemsize

    # --- Chip policy (trace-time Python).
    vmem_cap = _tpu_vmem_capacity_bytes()
    kind = _tpu_device_kind()
    two_tc = vmem_cap <= (64 << 20)                       # v7x: 64 MiB / TC, 2 TCs
    bf16_vpu = ("v6" in kind) or ("v7" in kind) or ("7x" in kind)
    vmem_budget = max(vmem_cap - (8 << 20), 32 << 20)     # headroom for internal scratch

    # --- Feature dims padded to 128-lane multiples (lane-dense stores, aligned MXU).
    in_p = _round_up(in_f, 128)
    hid_p = _round_up(hid_f, 128)
    out_p = _round_up(out_f, 128)

    # --- Batch tiling: no full-batch pad, only sublane alignment (<= 15 extra rows).
    sub = 8 if mb >= 4 else 16
    if block_b is None:
        block_b = 256 if two_tc else 512
    b_al = _round_up(B, sub)
    tb = min(_round_up(min(block_b, b_al), sub), b_al)
    n_tiles = _cdiv(b_al, tb)
    if two_tc and n_tiles > 1 and n_tiles % 2 == 1:
        # Balance work across the two TensorCores (avoid a 33% megacore tail).
        n_tiles += 1
        tb = min(_round_up(_cdiv(b_al, n_tiles), sub), b_al)
        n_tiles = _cdiv(b_al, tb)

    # --- Elementwise (bias + ReLU) dtype: bf16 on bf16-native VPUs, else f32.
    ew_dtype = jnp.bfloat16 if (mdt == jnp.dtype(jnp.bfloat16) and bf16_vpu) else jnp.float32

    # --- VMEM footprints (weights single-buffered in the resident path).
    def _resident_footprint(tb_):
        return (2 * tb_ * in_p * mb                      # x tile (double buffered)
                + 2 * tb_ * out_p * ob                   # out tile (double buffered)
                + (in_p * hid_p + hid_p * out_p) * mb    # weights, single buffered
                + (hid_p + out_p) * 4                    # biases
                + tb_ * hid_p * 4)                       # f32 intermediate h

    use_hidden_tiling = (block_h is not None) or (_resident_footprint(tb) > vmem_budget)

    if use_hidden_tiling:
        th_req = block_h if block_h is not None else 512
        th = max(128, _round_up(min(th_req, hid_p), 128))

        def _tiled_footprint(th_):
            return (2 * tb * in_p * mb                   # x tile
                    + 2 * tb * out_p * ob                # out tile
                    + 2 * (in_p * th_ + th_ * out_p) * mb  # streamed weight chunks
                    + 2 * th_ * 4 + out_p * 4            # biases
                    + tb * out_p * 4                     # f32 accumulator scratch
                    + tb * th_ * 4)                      # f32 intermediate h chunk

        while th > 128 and _tiled_footprint(th) > vmem_budget:
            th -= 128
        # Make th divide the padded hidden dim (zero padding is transparent:
        # relu(0 + 0) = 0 contributes nothing through zero-padded w2 rows).
        hid_p = _round_up(hid_f, th)
        footprint = _tiled_footprint(th)
    else:
        th = hid_p
        footprint = _resident_footprint(tb)

    vmem_limit = int(min(max(footprint + (8 << 20), 32 << 20), vmem_budget))

    # --- Pad + cast operands (features only; batch padded by at most sub-1 rows).
    x_p = _pad2d(x, b_al, in_p).astype(mdt)
    w1_p = _pad2d(w1, in_p, hid_p).astype(mdt)
    w2_p = _pad2d(w2, hid_p, out_p).astype(mdt)
    b1_p = _pad2d(b1, 1, hid_p).astype(ew_dtype)
    b2_p = _pad2d(b2, 1, out_p).astype(jnp.float32)

    # --- Advisory cost estimate for XLA's scheduler.
    flops = 2 * b_al * in_p * hid_p + 2 * b_al * hid_p * out_p
    bytes_accessed = (b_al * in_p * mb + b_al * out_p * ob
                      + (in_p * hid_p + hid_p * out_p) * mb
                      + hid_p * jnp.dtype(ew_dtype).itemsize + out_p * 4)
    cost = pl.CostEstimate(flops=int(flops), transcendentals=0,
                           bytes_accessed=int(bytes_accessed))

    if not use_hidden_tiling:
        out_padded = pl.pallas_call(
            _ffnn_resident_kernel,
            out_shape=jax.ShapeDtypeStruct((b_al, out_p), out_dtype),
            grid=(n_tiles,),
            in_specs=[
                pl.BlockSpec((tb, in_p), lambda i: (i, 0)),                  # x: batch-tiled
                pl.BlockSpec((in_p, hid_p), lambda i: (0, 0),
                             pipeline_mode=pl.Buffered(1)),                  # w1: resident
                pl.BlockSpec((1, hid_p), lambda i: (0, 0),
                             pipeline_mode=pl.Buffered(1)),                  # b1: resident
                pl.BlockSpec((hid_p, out_p), lambda i: (0, 0),
                             pipeline_mode=pl.Buffered(1)),                  # w2: resident
                pl.BlockSpec((1, out_p), lambda i: (0, 0),
                             pipeline_mode=pl.Buffered(1)),                  # b2: resident
            ],
            out_specs=pl.BlockSpec((tb, out_p), lambda i: (i, 0)),
            compiler_params=pltpu.CompilerParams(
                dimension_semantics=("parallel",),
                vmem_limit_bytes=vmem_limit),
            cost_estimate=cost,
        )(x_p, w1_p, b1_p, w2_p, b2_p)
    else:
        n_h = hid_p // th
        out_padded = pl.pallas_call(
            _ffnn_hidden_tiled_kernel,
            out_shape=jax.ShapeDtypeStruct((b_al, out_p), out_dtype),
            grid=(n_tiles, n_h),
            in_specs=[
                pl.BlockSpec((tb, in_p), lambda i, k: (i, 0)),     # x: reused across k
                pl.BlockSpec((in_p, th), lambda i, k: (0, k)),     # w1 hidden chunk
                pl.BlockSpec((1, th), lambda i, k: (0, k)),        # b1 hidden chunk
                pl.BlockSpec((th, out_p), lambda i, k: (k, 0)),    # w2 hidden chunk
                pl.BlockSpec((1, out_p), lambda i, k: (0, 0),
                             pipeline_mode=pl.Buffered(1)),        # b2: resident
            ],
            out_specs=pl.BlockSpec((tb, out_p), lambda i, k: (i, 0)),
            scratch_shapes=[pltpu.VMEM((tb, out_p), jnp.float32)],
            compiler_params=pltpu.CompilerParams(
                dimension_semantics=("parallel", "arbitrary"),
                vmem_limit_bytes=vmem_limit),
            cost_estimate=cost,
        )(x_p, w1_p, b1_p, w2_p, b2_p)

    return out_padded[:B, :out_f]


def init_linear_params(key, in_f, out_f, dtype=jnp.float32):
    # Deterministic init mimicking PyTorch Linear's uniform(-1/sqrt(in), 1/sqrt(in)).
    k_w, k_b = jax.random.split(key)
    bound = 1.0 / jnp.sqrt(jnp.asarray(in_f, dtype))
    w = jax.random.uniform(k_w, (in_f, out_f), dtype, -bound, bound)  # stored (in, out)
    b = jax.random.uniform(k_b, (1, out_f), dtype, -bound, bound)
    return w, b


if __name__ == "__main__":
    key = jax.random.PRNGKey(0)
    k_x, k_fc1, k_fc2, k_big, k_fc1b, k_fc2b = jax.random.split(key, 6)

    batch = 8
    input_feature = 32
    hidden_feature = 64
    output_feature = 16

    x = jax.random.normal(k_x, (batch, input_feature), jnp.float32)
    w1, b1 = init_linear_params(k_fc1, input_feature, hidden_feature)
    w2, b2 = init_linear_params(k_fc2, hidden_feature, output_feature)

    ref = jnp.maximum(x @ w1 + b1, 0.0) @ w2 + b2

    # f32 path (matches PyTorch module numerics).
    out = jax.block_until_ready(ffnn_forward(x, w1, b1, w2, b2))
    assert out.shape == (batch, output_feature)
    assert jnp.allclose(out, ref, atol=1e-5, rtol=1e-5)

    # bf16 matmul path (f32 accumulation), looser tolerance.
    out_bf16 = jax.block_until_ready(
        ffnn_forward(x, w1, b1, w2, b2, matmul_dtype=jnp.bfloat16))
    assert out_bf16.shape == (batch, output_feature)
    assert jnp.allclose(out_bf16, ref, atol=3e-2, rtol=3e-2)

    # Multi-tile batch with a ragged last tile (masked partial store path).
    x_rag = jax.random.normal(k_big, (200, input_feature), jnp.float32)
    ref_rag = jnp.maximum(x_rag @ w1 + b1, 0.0) @ w2 + b2
    out_rag = jax.block_until_ready(
        ffnn_forward(x_rag, w1, b1, w2, b2, block_b=128))
    assert out_rag.shape == (200, output_feature)
    assert jnp.allclose(out_rag, ref_rag, atol=1e-5, rtol=1e-5)

    # Hidden-dim-tiled fallback path (forced via block_h): accumulator + pl.when.
    hidden_big = 256
    w1b, b1b = init_linear_params(k_fc1b, input_feature, hidden_big)
    w2b, b2b = init_linear_params(k_fc2b, hidden_big, output_feature)
    x_big = jax.random.normal(k_big, (384, input_feature), jnp.float32)
    ref_big = jnp.maximum(x_big @ w1b + b1b, 0.0) @ w2b + b2b
    out_res = jax.block_until_ready(
        ffnn_forward(x_big, w1b, b1b, w2b, b2b, block_b=128))
    assert jnp.allclose(out_res, ref_big, atol=1e-5, rtol=1e-5)
    out_ht = jax.block_until_ready(
        ffnn_forward(x_big, w1b, b1b, w2b, b2b, block_b=128, block_h=128))
    assert out_ht.shape == (384, output_feature)
    assert jnp.allclose(out_ht, ref_big, atol=1e-5, rtol=1e-5)

    print("KERNEL_OK")
</pallas_src>

<mosaic_0001>
module attributes {stable_mosaic.version = 11 : i64} {
  func.func @_ffnn_resident_kernel(%arg0: i32, %arg1: memref<8x128xf32, #tpu.memory_space<vmem>>, %arg2: memref<128x128xf32, #tpu.memory_space<vmem>>, %arg3: memref<1x128xf32, #tpu.memory_space<vmem>>, %arg4: memref<128x128xf32, #tpu.memory_space<vmem>>, %arg5: memref<1x128xf32, #tpu.memory_space<vmem>>, %arg6: memref<8x128xf32, #tpu.memory_space<vmem>>) attributes {dimension_semantics = [#tpu.dimension_semantics<parallel>], iteration_bounds = array<i64: 1>, scalar_prefetch = 0 : i64, scratch_operands = 0 : i64, tpu.core_type = #tpu.core_type<tc>, window_params = [{transform_indices = @transform_0, window_bounds = array<i64: 8, 128>}, {pipeline_mode = #tpu.pipeline_mode<synchronous>, transform_indices = @transform_1, window_bounds = array<i64: 128, 128>}, {pipeline_mode = #tpu.pipeline_mode<synchronous>, transform_indices = @transform_2, window_bounds = array<i64: 1, 128>}, {pipeline_mode = #tpu.pipeline_mode<synchronous>, transform_indices = @transform_3, window_bounds = array<i64: 128, 128>}, {pipeline_mode = #tpu.pipeline_mode<synchronous>, transform_indices = @transform_4, window_bounds = array<i64: 1, 128>}, {transform_indices = @transform_5, window_bounds = array<i64: 8, 128>}]} {
    %c0 = arith.constant 0 : index
    %c0_0 = arith.constant 0 : index
    %0 = vector.load %arg1[%c0, %c0_0] : memref<8x128xf32, #tpu.memory_space<vmem>>, vector<8x128xf32>
    %c0_1 = arith.constant 0 : index
    %c0_2 = arith.constant 0 : index
    %1 = vector.load %arg2[%c0_1, %c0_2] : memref<128x128xf32, #tpu.memory_space<vmem>>, vector<128x128xf32>
    %cst = arith.constant dense<0.000000e+00> : vector<8x128xf32>
    %2 = tpu.matmul %0, %1, %cst {dimension_numbers = #tpu.dot_dimension_numbers<[1], [0], [0], [1], [0, 0, 1, 1], [], []>} : vector<8x128xf32>, vector<128x128xf32>, vector<8x128xf32> -> vector<8x128xf32>
    %c0_3 = arith.constant 0 : index
    %c0_4 = arith.constant 0 : index
    %3 = vector.load %arg3[%c0_3, %c0_4] : memref<1x128xf32, #tpu.memory_space<vmem>>, vector<1x128xf32>
    %4 = vector.broadcast %3 : vector<1x128xf32> to vector<8x128xf32>
    %5 = arith.addf %2, %4 : vector<8x128xf32>
    %cst_5 = arith.constant 0.000000e+00 : f32
    %6 = vector.broadcast %cst_5 : f32 to vector<8x128xf32>
    %7 = arith.maximumf %5, %6 : vector<8x128xf32>
    %c0_6 = arith.constant 0 : index
    %c0_7 = arith.constant 0 : index
    %8 = vector.load %arg4[%c0_6, %c0_7] : memref<128x128xf32, #tpu.memory_space<vmem>>, vector<128x128xf32>
    %cst_8 = arith.constant dense<0.000000e+00> : vector<8x128xf32>
    %9 = tpu.matmul %7, %8, %cst_8 {dimension_numbers = #tpu.dot_dimension_numbers<[1], [0], [0], [1], [0, 0, 1, 1], [], []>} : vector<8x128xf32>, vector<128x128xf32>, vector<8x128xf32> -> vector<8x128xf32>
    %c0_9 = arith.constant 0 : index
    %c0_10 = arith.constant 0 : index
    %10 = vector.load %arg5[%c0_9, %c0_10] : memref<1x128xf32, #tpu.memory_space<vmem>>, vector<1x128xf32>
    %11 = vector.broadcast %10 : vector<1x128xf32> to vector<8x128xf32>
    %12 = arith.addf %9, %11 : vector<8x128xf32>
    %c0_11 = arith.constant 0 : index
    %c0_12 = arith.constant 0 : index
    %13 = vector.load %arg6[%c0_11, %c0_12] : memref<8x128xf32, #tpu.memory_space<vmem>>, vector<8x128xf32>
    tpu.vector_store %arg6[%c0_11, %c0_12], %12 {strides = array<i32>} : memref<8x128xf32, #tpu.memory_space<vmem>>, vector<8x128xf32>,
    return
  }
  func.func @transform_0(%arg0: i32) -> (i32, i32) {
    %c0_i32 = arith.constant 0 : i32
    %c0_i32_0 = arith.constant 0 : i32
    return %arg0, %c0_i32 : i32, i32
  }
  func.func @transform_1(%arg0: i32) -> (i32, i32) {
    %c0_i32 = arith.constant 0 : i32
    %c0_i32_0 = arith.constant 0 : i32
    %c0_i32_1 = arith.constant 0 : i32
    return %c0_i32, %c0_i32_0 : i32, i32
  }
  func.func @transform_2(%arg0: i32) -> (i32, i32) {
    %c0_i32 = arith.constant 0 : i32
    %c0_i32_0 = arith.constant 0 : i32
    %c0_i32_1 = arith.constant 0 : i32
    return %c0_i32, %c0_i32_0 : i32, i32
  }
  func.func @transform_3(%arg0: i32) -> (i32, i32) {
    %c0_i32 = arith.constant 0 : i32
    %c0_i32_0 = arith.constant 0 : i32
    %c0_i32_1 = arith.constant 0 : i32
    return %c0_i32, %c0_i32_0 : i32, i32
  }
  func.func @transform_4(%arg0: i32) -> (i32, i32) {
    %c0_i32 = arith.constant 0 : i32
    %c0_i32_0 = arith.constant 0 : i32
    %c0_i32_1 = arith.constant 0 : i32
    return %c0_i32, %c0_i32_0 : i32, i32
  }
  func.func @transform_5(%arg0: i32) -> (i32, i32) {
    %c0_i32 = arith.constant 0 : i32
    %c0_i32_0 = arith.constant 0 : i32
    return %arg0, %c0_i32 : i32, i32
  }
}

</mosaic_0001>

<bundles_post_ra>
// kernel: ffnn_forward.1
= control target key start
LH: loop header
LB: loop body
LE: loop exit
PB: predicated region body
PF: predicated region fallthrough
CT: control target
= control target key end

     0   :  { %v355_v1 = vmov 0.0   ;;  %vm356_vm0 = vmmov 0   ;;  %s530_s0 = inlined_call_operand.vmem [shape: f32[8,128], index: 0, kind: input, shape index: {}]   ;;  %s531_s1 = inlined_call_operand.vmem [shape: f32[128,128], index: 1, kind: input, shape index: {}]   ;;  %s532_s2 = inlined_call_operand.vmem [shape: f32[1,128], index: 2, kind: input, shape index: {}]   ;;  %s533_s3 = inlined_call_operand.vmem [shape: f32[128,128], index: 3, kind: input, shape index: {}]   ;;  %s534_s4 = inlined_call_operand.vmem [shape: f32[1,128], index: 4, kind: input, shape index: {}]   ;;  %s535_s5 = inlined_call_operand.hbm [shape: f32[8,128], index: 5, kind: output, shape index: {}]  }
   0x1   :  { %v37_v0 = vld [vmem:[%s531_s1 + $0x78] sm:$0xff]  ;;  %260 = vmatprep.subr.mxu0 %v355_v1  ;;  %v36_v2 = vld [vmem:[%s531_s1 + $0x70] sm:$0xff]  ;;  %292 = vmatprep.mubr.msk.f32.mxu0 %vm356_vm0, %v355_v1  ;;  %v35_v3 = vld [vmem:[%s531_s1 + $0x68] sm:$0xff] }
   0x2   :  { %261 = vmatpush3.msra.mxu0 %v37_v0  ;;  %295 = vmatprep.subr.mxu1 %v355_v1  ;;  %v34_v4 = vld [vmem:[%s531_s1 + $0x60] sm:$0xff]  ;;  %v131_v5 = vld [vmem:[%s533_s3 + $0x78] sm:$0xff]  ;;  %v130_v6 = vld [vmem:[%s533_s3 + $0x70] sm:$0xff] }
   0x3   :  { %262 = vmatprep.subr.mxu0 %v355_v1  ;;  %327 = vmatprep.mubr.msk.f32.mxu1 %vm356_vm0, %v355_v1  ;;  %v33_v7 = vld [vmem:[%s531_s1 + $0x58] sm:$0xff]  ;;  %v129_v8 = vld [vmem:[%s533_s3 + $0x68] sm:$0xff]  ;;  %v32_v9 = vld [vmem:[%s531_s1 + $0x50] sm:$0xff] }
   0x4   :  { %263 = vmatpush3.msra.mxu0 %v36_v2  ;;  %296 = vmatpush3.msra.mxu1 %v131_v5  ;;  %v128_v10 = vld [vmem:[%s533_s3 + $0x60] sm:$0xff] }
   0x5   :  { %264 = vmatprep.subr.mxu0 %v355_v1  ;;  %297 = vmatprep.subr.mxu1 %v355_v1 }
   0x6   :  { %265 = vmatpush3.msra.mxu0 %v35_v3  ;;  %298 = vmatpush3.msra.mxu1 %v130_v6 }
   0x7   :  { %266 = vmatprep.subr.mxu0 %v355_v1  ;;  %299 = vmatprep.subr.mxu1 %v355_v1 }
   0x8   :  { %267 = vmatpush3.msra.mxu0 %v34_v4  ;;  %300 = vmatpush3.msra.mxu1 %v129_v8 }
   0x9   :  { %268 = vmatprep.subr.mxu0 %v355_v1 }
   0xa   :  { %269 = vmatpush3.msra.mxu0 %v33_v7 }
   0xb   :  { %10 = vsyncpa [#allocation3], 0  ;;  %270 = vmatprep.subr.mxu0 %v355_v1  ;;  %v31_v11 = vld [vmem:[%s531_s1 + $0x48] sm:$0xff]  ;;  %301 = vmatprep.subr.mxu1 %v355_v1  ;;  %v127_v12 = vld [vmem:[%s533_s3 + $0x58] sm:$0xff]  ;;  %s357_s11 = smov [#allocation2]  }
   0xc   :  { %271 = vmatpush3.msra.mxu0 %v32_v9  ;;  %302 = vmatpush3.msra.mxu1 %v128_v10  ;;  %v30_v13 = vld [vmem:[%s531_s1 + $0x40] sm:$0xff]  ;;  %v126_v14 = vld [vmem:[%s533_s3 + $0x50] sm:$0xff]  ;;  %v29_v15 = vld [vmem:[%s531_s1 + $0x38] sm:$0xff]  ;;  %s216_s12 = sshll.u32 %s357_s11, 4  ;;  %s217_s12 = int_to_ptr.vmem [resolvable:$true] %s216_s12 }
   0xd   :  { %272 = vmatprep.subr.mxu0 %v355_v1  ;;  %303 = vmatprep.subr.mxu1 %v355_v1  ;;  %v125_v16 = vld [vmem:[%s533_s3 + $0x48] sm:$0xff]  ;;  %v28_v17 = vld [vmem:[%s531_s1 + $0x30] sm:$0xff]  ;;  %v124_v18 = vld [vmem:[%s533_s3 + $0x40] sm:$0xff]  ;;  %p338_p1 = scmp.lt.s32.totalorder %s217_s12, %s217_s12 }
   0xe   :  { %273 = vmatpush3.msra.mxu0 %v31_v11  ;;  %304 = vmatpush3.msra.mxu1 %v127_v12  ;;  %v27_v19 = vld [vmem:[%s531_s1 + $0x28] sm:$0xff]  ;;  %v123_v20 = vld [vmem:[%s533_s3 + $0x38] sm:$0xff]  ;;  %v26_v21 = vld [vmem:[%s531_s1 + $0x20] sm:$0xff] }
   0xf   :  { %274 = vmatprep.subr.mxu0 %v355_v1  ;;  %305 = vmatprep.subr.mxu1 %v355_v1  ;;  %v122_v22 = vld [vmem:[%s533_s3 + $0x30] sm:$0xff]  ;;  %v25_v23 = vld [vmem:[%s531_s1 + $0x18] sm:$0xff]  ;;  %v121_v24 = vld [vmem:[%s533_s3 + $0x28] sm:$0xff] }
  0x10   :  { %275 = vmatpush3.msra.mxu0 %v30_v13  ;;  %306 = vmatpush3.msra.mxu1 %v126_v14  ;;  %v24_v25 = vld [vmem:[%s531_s1 + $0x10] sm:$0xff]  ;;  %v120_v26 = vld [vmem:[%s533_s3 + $0x20] sm:$0xff]  ;;  %v23_v27 = vld [vmem:[%s531_s1 + $0x8] sm:$0xff] }
  0x11   :  { %276 = vmatprep.subr.mxu0 %v355_v1  ;;  %307 = vmatprep.subr.mxu1 %v355_v1  ;;  %v119_v28 = vld [vmem:[%s533_s3 + $0x18] sm:$0xff]  ;;  %v22_v29 = vld [vmem:[%s531_s1] sm:$0xff]  ;;  %v118_v31 = vld [vmem:[%s533_s3 + $0x10] sm:$0xff] }
  0x12   :  { %277 = vmatpush3.msra.mxu0 %v29_v15  ;;  %308 = vmatpush3.msra.mxu1 %v125_v16  ;;  %v21_v30 = vld [vmem:[%s530_s0] sm:$0xff]  ;;  %v117_v32 = vld [vmem:[%s533_s3 + $0x8] sm:$0xff] }
  0x13   :  { %278 = vmatprep.subr.mxu0 %v355_v1  ;;  %309 = vmatprep.subr.mxu1 %v355_v1  ;;  %v116_v33 = vld [vmem:[%s533_s3] sm:$0xff]  ;;  %s333_s3 = scalar_lea.vmem %s217_s12, 128 }
  0x14   :  { %279 = vmatpush3.msra.mxu0 %v28_v17  ;;  %310 = vmatpush3.msra.mxu1 %v124_v18  ;;  %v224_v34 = vld [vmem:[%s532_s2] ss:$0 sm:$0xff]  ;;  %p334_p0 = scmp.ne.s32.totalorder %s217_s12, %s333_s3  ;;  %p339_p2 = scmp.lt.s32.totalorder %s333_s3, %s333_s3 }
  0x15   :  { %280 = vmatprep.subr.mxu0 %v355_v1  ;;  %311 = vmatprep.subr.mxu1 %v355_v1  ;;  %v225_v39 = vld [vmem:[%s534_s4] ss:$0 sm:$0xff] }
  0x16   :  { %281 = vmatpush3.msra.mxu0 %v27_v19  ;;  %312 = vmatpush3.msra.mxu1 %v123_v20  ;;  %p340_p3 = por %p339_p2, %p338_p1 }
  0x17   :  { %282 = vmatprep.subr.mxu0 %v355_v1  ;;  %313 = vmatprep.subr.mxu1 %v355_v1 }
  0x18   :  { %283 = vmatpush3.msra.mxu0 %v26_v21  ;;  %314 = vmatpush3.msra.mxu1 %v122_v22  ;;  %p341_p4 = pnand %p340_p3, %p334_p0 }
  0x19   :  { %284 = vmatprep.subr.mxu0 %v355_v1  ;;  %315 = vmatprep.subr.mxu1 %v355_v1 }
  0x1a   :  { %285 = vmatpush3.msra.mxu0 %v25_v23  ;;  %316 = vmatpush3.msra.mxu1 %v121_v24 }
  0x1b   :  { %286 = vmatprep.subr.mxu0 %v355_v1  ;;  %317 = vmatprep.subr.mxu1 %v355_v1 }
  0x1c   :  { %287 = vmatpush3.msra.mxu0 %v24_v25  ;;  %318 = vmatpush3.msra.mxu1 %v120_v26 }
  0x1d   :  { %288 = vmatprep.subr.mxu0 %v355_v1  ;;  %319 = vmatprep.subr.mxu1 %v355_v1 }
  0x1e   :  { %289 = vmatpush3.msra.mxu0 %v23_v27  ;;  %320 = vmatpush3.msra.mxu1 %v119_v28 }
  0x1f   :  { %290 = vmatprep.subr.mxu0 %v355_v1  ;;  %321 = vmatprep.subr.mxu1 %v355_v1 }
  0x20   :  { %291 = vmatpush3.msra.mxu0 %v22_v29  ;;  %322 = vmatpush3.msra.mxu1 %v118_v31 }
  0x21   :  { %293 = vmatmul.mubr.f32.vlgmr.msra.gmra.mxu0 %v21_v30  ;;  %323 = vmatprep.subr.mxu1 %v355_v1 }
  0x22   :  { %324 = vmatpush3.msra.mxu1 %v117_v32 }
  0x23   :  { %325 = vmatprep.subr.mxu1 %v355_v1 }
  0x24   :  { %326 = vmatpush3.msra.mxu1 %v116_v33 }
  0xe1   :  { %v111_v35 = vpop.f32.mrf.mxu0 }
  0xe2   :  { %v112_v36 = vadd.f32 %v224_v34, %v111_v35 }
  0xe3   :  { %v294_v37 = vpop.f32.mrf.mxu0 }
  0xe4   :  { %v115_v38 = vmax.f32 %v112_v36, 0.0 }
  0xe6   :  { %328 = vmatmul.mubr.f32.vlgmr.msra.gmra.mxu1 %v115_v38 }
 0x1a6   :  { %v205_v40 = vpop.f32.mrf.mxu1 }
 0x1a7   :  { %v206_v41 = vadd.f32 %v225_v39, %v205_v40 }
 0x1a8   :  { %v329_v42 = vpop.f32.mrf.mxu1 }
 0x1a9   :  { %209 = vst [vmem:[#allocation2] sm:$0xff] %v206_v41 }
 0x1aa   :  { %344 = shalt.err (!%p341_p4)
}
 0x1ab   :  { %219 = dma.vmem_to_hbm [thread:$0]  %s217_s12, 128, %s535_s5, [#allocation3]  }
 0x1ac   :  { %353 = dma.done.wait [#allocation3], 128  }
 0x1ad   :  { %354 = vsyncadd [#allocation3], 4294967168 }
 0x1ae   :  { %223 = vsyncpa [#allocation3], 1 }

</bundles_post_ra>
